<compile_context>
chip_gen: v7x
topology: tpu7x:2x2x1
jax: 0.10.0
libtpu: 0.0.40
codegen_flags: <defaults>
</compile_context>

<pallas_src>
import jax
import jax.numpy as jnp
from jax.experimental import pallas as pl
from jax.experimental.pallas import tpu as pltpu

_LANE = 128          # lane width (last dim) for dense vreg / MXU tiles
_BF16_SUBLANE = 16   # one bf16 vreg packs [16, 128] rows x lanes
_LAYERS = ("fc1", "fc2", "fc3", "fc4", "fc5", "fc6", "fc7")


def _round_up(n, m):
    return ((n + m - 1) // m) * m


# --------------------------------------------------------------------------- #
# Kernel
# --------------------------------------------------------------------------- #
def _autoencoder_kernel(x_ref, *refs):
    """refs = (w1, b1, ..., w7, b7, out). All tiles lane-padded to 128."""
    out_ref = refs[-1]
    wb = refs[:-1]

    def linear(h_bf16, w_ref, b_ref):
        # bf16 x bf16 MXU matmul with f32 accumulation, f32 bias add (VPU).
        return (
            jnp.dot(h_bf16, w_ref[...], preferred_element_type=jnp.float32)
            + b_ref[...]
        )

    def relu_bf16(h_f32):
        # Cast first: bf16 VALU halves ReLU op count on v6e/v7x; exact for ReLU.
        return jnp.maximum(h_f32.astype(jnp.bfloat16), 0.0)

    h = x_ref[...]                                  # bf16, lane-padded
    for li in range(7):
        w_ref, b_ref = wb[2 * li], wb[2 * li + 1]
        z = linear(h, w_ref, b_ref)
        if li < 6:
            h = relu_bf16(z)                        # fc1..fc6 + ReLU (dropout = id)
        else:
            out_ref[...] = z.astype(out_ref.dtype)  # fc7, no activation


# --------------------------------------------------------------------------- #
# One-time parameter padding (hoisted out of the forward path)
# --------------------------------------------------------------------------- #
def pad_params(params):
    """Zero-pad every weight/bias to lane multiples and cast weights to bf16.

    Call once after init; the forward pass reuses the padded/cast arrays.
    Zero padding is exact: padded rows/cols/bias entries are zero, so padded
    activation lanes stay zero through every layer.
    """
    padded = {}
    for name in _LAYERS:
        w, b = params[name]                         # w: (fan_in, fan_out)
        fi_p = _round_up(w.shape[0], _LANE)
        fo_p = _round_up(w.shape[1], _LANE)
        w_p = (
            jnp.zeros((fi_p, fo_p), jnp.bfloat16)
            .at[: w.shape[0], : w.shape[1]]
            .set(w.astype(jnp.bfloat16))
        )
        b_p = (
            jnp.zeros((1, fo_p), jnp.float32)
            .at[0, : b.shape[0]]
            .set(b.astype(jnp.float32))
        )
        padded[name] = (w_p, b_p)
    return padded


def _pick_batch_tile(batch):
    """Fat tiles for big batches; bf16-sublane-aligned tiles for small ones."""
    if batch >= 512:
        return 512
    if batch >= 256:
        return 256
    if batch >= 128:
        return 128
    tb = _round_up(batch, _BF16_SUBLANE)
    # Give the "parallel" batch axis >= 2 grid steps when possible so both
    # TensorCores on v7x get work (no-op / harmless on v5e/v6e).
    if tb >= 2 * _BF16_SUBLANE and (tb // 2) % _BF16_SUBLANE == 0:
        tb //= 2
    return tb


def _vmem_limit_bytes(padded_params, tb, in_p):
    """Request what we actually need, capped below physical per-TC capacity."""
    w_bytes = sum(
        w.size * w.dtype.itemsize + b.size * b.dtype.itemsize
        for w, b in padded_params.values()
    )                                                   # single-buffered residents
    io_bytes = 2 * 2 * (tb * in_p * 2)                  # x + out bf16 tiles, double-buffered
    scratch = 4 * 1024 * 1024                           # activations + Mosaic internals
    need = w_bytes + io_bytes + scratch
    try:
        cap = int(pltpu.get_tpu_info().vmem_capacity_bytes)
    except Exception:                                   # pragma: no cover - conservative fallback
        cap = 64 * 1024 * 1024                          # v7x per-TC size
    # Never request full physical capacity; leave headroom for compiler scratch.
    return int(min(max(need, 32 * 1024 * 1024), cap * 7 // 8))


# --------------------------------------------------------------------------- #
# Forward
# --------------------------------------------------------------------------- #
def autoencoder_forward(x, padded_params):
    """x: (B, input_size) float32; padded_params from pad_params()."""
    B, input_size = x.shape
    in_p = padded_params["fc1"][0].shape[0]
    assert padded_params["fc7"][0].shape[1] == in_p, "fc7 must map back to input_size"
    assert input_size <= in_p

    tb = _pick_batch_tile(B)
    b_pad = _round_up(B, tb)

    # Lane/sublane-padded bf16 input (padded rows/lanes are zero).
    x_p = (
        jnp.zeros((b_pad, in_p), jnp.bfloat16)
        .at[:B, :input_size]
        .set(x.astype(jnp.bfloat16))
    )

    flat_args = [x_p]
    in_specs = [pl.BlockSpec((tb, in_p), lambda i: (i, 0))]
    for name in _LAYERS:
        w_p, b_p = padded_params[name]
        flat_args += [w_p, b_p]
        # Constant index maps -> stay resident in VMEM across all batch steps;
        # Buffered(1) -> single-buffered (no pointless second copy of residents).
        in_specs += [
            pl.BlockSpec(w_p.shape, lambda i: (0, 0), pipeline_mode=pl.Buffered(1)),
            pl.BlockSpec(b_p.shape, lambda i: (0, 0), pipeline_mode=pl.Buffered(1)),
        ]

    # TODO(synk): all 7 weights are assumed VMEM-resident; for hidden sizes where
    # the bf16 weight footprint exceeds ~50% of per-TC VMEM a K/N-tiled
    # (emit_pipeline) fallback path would be required.

    out_p = pl.pallas_call(
        _autoencoder_kernel,
        out_shape=jax.ShapeDtypeStruct((b_pad, in_p), jnp.bfloat16),
        grid=(b_pad // tb,),
        in_specs=in_specs,
        out_specs=pl.BlockSpec((tb, in_p), lambda i: (i, 0)),
        compiler_params=pltpu.CompilerParams(
            dimension_semantics=("parallel",),   # dual-TC on v7x, harmless elsewhere
            vmem_limit_bytes=_vmem_limit_bytes(padded_params, tb, in_p),
        ),
    )(*flat_args)

    # Padded batch rows / feature lanes are garbage/zero; slice them off here.
    return out_p[:B, :input_size].astype(jnp.float32)


# --------------------------------------------------------------------------- #
# Test harness
# --------------------------------------------------------------------------- #
def init_params(key, input_size, hidden_size, test_size):
    """Deterministic synthetic weights matching nn.Linear shapes.
    PyTorch Linear weight is (out, in); we store the transpose (in, out)."""
    dims = [
        ("fc1", input_size, hidden_size),
        ("fc2", hidden_size, hidden_size),
        ("fc3", hidden_size, test_size),
        ("fc4", test_size, hidden_size),
        ("fc5", hidden_size, hidden_size),
        ("fc6", hidden_size, hidden_size),
        ("fc7", hidden_size, input_size),
    ]
    params = {}
    for name, fan_in, fan_out in dims:
        key, kw, kb = jax.random.split(key, 3)
        bound = 1.0 / jnp.sqrt(fan_in)
        w = jax.random.uniform(kw, (fan_in, fan_out), jnp.float32, -bound, bound)
        b = jax.random.uniform(kb, (fan_out,), jnp.float32, -bound, bound)
        params[name] = (w, b)
    return params


def reference_forward(x, params):
    """Pure-JAX reference mirroring the kernel's bf16-in / f32-accumulate matmuls."""
    h = x
    for i, name in enumerate(_LAYERS):
        w, b = params[name]
        h = (
            jnp.dot(
                h.astype(jnp.bfloat16),
                w.astype(jnp.bfloat16),
                preferred_element_type=jnp.float32,
            )
            + b
        )
        if i < len(_LAYERS) - 1:
            h = jnp.maximum(h, 0.0)
    return h


if __name__ == "__main__":
    # TODO(synk): dropout implemented as eval-mode identity (no RNG masking);
    # the BatchNorm1d created in __init__ is never used by forward().
    batch, input_size, hidden_size, test_size = 8, 32, 32, 16

    key = jax.random.PRNGKey(0)
    key, kx = jax.random.split(key)
    x = jax.random.normal(kx, (batch, input_size), jnp.float32)
    params = init_params(key, input_size, hidden_size, test_size)

    # One-time padding / bf16 cast, hoisted out of the forward path.
    padded_params = pad_params(params)
    padded_params = jax.block_until_ready(padded_params)

    fwd = jax.jit(autoencoder_forward)
    out = jax.block_until_ready(fwd(x, padded_params))

    ref = reference_forward(x, params)
    assert out.shape == (batch, input_size)
    assert jnp.allclose(out, ref, atol=1e-2, rtol=1e-2)

    print("KERNEL_OK")
</pallas_src>

<mosaic_0001>
module attributes {stable_mosaic.version = 11 : i64} {
  func.func @_autoencoder_kernel(%arg0: i32, %arg1: memref<16x128xbf16, #tpu.memory_space<vmem>>, %arg2: memref<128x128xbf16, #tpu.memory_space<vmem>>, %arg3: memref<1x128xf32, #tpu.memory_space<vmem>>, %arg4: memref<128x128xbf16, #tpu.memory_space<vmem>>, %arg5: memref<1x128xf32, #tpu.memory_space<vmem>>, %arg6: memref<128x128xbf16, #tpu.memory_space<vmem>>, %arg7: memref<1x128xf32, #tpu.memory_space<vmem>>, %arg8: memref<128x128xbf16, #tpu.memory_space<vmem>>, %arg9: memref<1x128xf32, #tpu.memory_space<vmem>>, %arg10: memref<128x128xbf16, #tpu.memory_space<vmem>>, %arg11: memref<1x128xf32, #tpu.memory_space<vmem>>, %arg12: memref<128x128xbf16, #tpu.memory_space<vmem>>, %arg13: memref<1x128xf32, #tpu.memory_space<vmem>>, %arg14: memref<128x128xbf16, #tpu.memory_space<vmem>>, %arg15: memref<1x128xf32, #tpu.memory_space<vmem>>, %arg16: memref<16x128xbf16, #tpu.memory_space<vmem>>) attributes {dimension_semantics = [#tpu.dimension_semantics<parallel>], iteration_bounds = array<i64: 1>, scalar_prefetch = 0 : i64, scratch_operands = 0 : i64, tpu.core_type = #tpu.core_type<tc>, window_params = [{transform_indices = @transform_0, window_bounds = array<i64: 16, 128>}, {pipeline_mode = #tpu.pipeline_mode<synchronous>, transform_indices = @transform_1, window_bounds = array<i64: 128, 128>}, {pipeline_mode = #tpu.pipeline_mode<synchronous>, transform_indices = @transform_2, window_bounds = array<i64: 1, 128>}, {pipeline_mode = #tpu.pipeline_mode<synchronous>, transform_indices = @transform_3, window_bounds = array<i64: 128, 128>}, {pipeline_mode = #tpu.pipeline_mode<synchronous>, transform_indices = @transform_4, window_bounds = array<i64: 1, 128>}, {pipeline_mode = #tpu.pipeline_mode<synchronous>, transform_indices = @transform_5, window_bounds = array<i64: 128, 128>}, {pipeline_mode = #tpu.pipeline_mode<synchronous>, transform_indices = @transform_6, window_bounds = array<i64: 1, 128>}, {pipeline_mode = #tpu.pipeline_mode<synchronous>, transform_indices = @transform_7, window_bounds = array<i64: 128, 128>}, {pipeline_mode = #tpu.pipeline_mode<synchronous>, transform_indices = @transform_8, window_bounds = array<i64: 1, 128>}, {pipeline_mode = #tpu.pipeline_mode<synchronous>, transform_indices = @transform_9, window_bounds = array<i64: 128, 128>}, {pipeline_mode = #tpu.pipeline_mode<synchronous>, transform_indices = @transform_10, window_bounds = array<i64: 1, 128>}, {pipeline_mode = #tpu.pipeline_mode<synchronous>, transform_indices = @transform_11, window_bounds = array<i64: 128, 128>}, {pipeline_mode = #tpu.pipeline_mode<synchronous>, transform_indices = @transform_12, window_bounds = array<i64: 1, 128>}, {pipeline_mode = #tpu.pipeline_mode<synchronous>, transform_indices = @transform_13, window_bounds = array<i64: 128, 128>}, {pipeline_mode = #tpu.pipeline_mode<synchronous>, transform_indices = @transform_14, window_bounds = array<i64: 1, 128>}, {transform_indices = @transform_15, window_bounds = array<i64: 16, 128>}]} {
    %c0 = arith.constant 0 : index
    %c0_0 = arith.constant 0 : index
    %0 = vector.load %arg1[%c0, %c0_0] : memref<16x128xbf16, #tpu.memory_space<vmem>>, vector<16x128xbf16>
    %c0_1 = arith.constant 0 : index
    %c0_2 = arith.constant 0 : index
    %1 = vector.load %arg2[%c0_1, %c0_2] : memref<128x128xbf16, #tpu.memory_space<vmem>>, vector<128x128xbf16>
    %cst = arith.constant dense<0.000000e+00> : vector<16x128xf32>
    %2 = tpu.matmul %0, %1, %cst {dimension_numbers = #tpu.dot_dimension_numbers<[1], [0], [0], [1], [0, 0, 1, 1], [], []>} : vector<16x128xbf16>, vector<128x128xbf16>, vector<16x128xf32> -> vector<16x128xf32>
    %c0_3 = arith.constant 0 : index
    %c0_4 = arith.constant 0 : index
    %3 = vector.load %arg3[%c0_3, %c0_4] : memref<1x128xf32, #tpu.memory_space<vmem>>, vector<1x128xf32>
    %4 = vector.broadcast %3 : vector<1x128xf32> to vector<16x128xf32>
    %5 = arith.addf %2, %4 : vector<16x128xf32>
    %6 = arith.truncf %5 : vector<16x128xf32> to vector<16x128xbf16>
    %cst_5 = arith.constant 0.000000e+00 : bf16
    %7 = vector.broadcast %cst_5 : bf16 to vector<16x128xbf16>
    %8 = arith.maximumf %6, %7 : vector<16x128xbf16>
    %c0_6 = arith.constant 0 : index
    %c0_7 = arith.constant 0 : index
    %9 = vector.load %arg4[%c0_6, %c0_7] : memref<128x128xbf16, #tpu.memory_space<vmem>>, vector<128x128xbf16>
    %cst_8 = arith.constant dense<0.000000e+00> : vector<16x128xf32>
    %10 = tpu.matmul %8, %9, %cst_8 {dimension_numbers = #tpu.dot_dimension_numbers<[1], [0], [0], [1], [0, 0, 1, 1], [], []>} : vector<16x128xbf16>, vector<128x128xbf16>, vector<16x128xf32> -> vector<16x128xf32>
    %c0_9 = arith.constant 0 : index
    %c0_10 = arith.constant 0 : index
    %11 = vector.load %arg5[%c0_9, %c0_10] : memref<1x128xf32, #tpu.memory_space<vmem>>, vector<1x128xf32>
    %12 = vector.broadcast %11 : vector<1x128xf32> to vector<16x128xf32>
    %13 = arith.addf %10, %12 : vector<16x128xf32>
    %14 = arith.truncf %13 : vector<16x128xf32> to vector<16x128xbf16>
    %cst_11 = arith.constant 0.000000e+00 : bf16
    %15 = vector.broadcast %cst_11 : bf16 to vector<16x128xbf16>
    %16 = arith.maximumf %14, %15 : vector<16x128xbf16>
    %c0_12 = arith.constant 0 : index
    %c0_13 = arith.constant 0 : index
    %17 = vector.load %arg6[%c0_12, %c0_13] : memref<128x128xbf16, #tpu.memory_space<vmem>>, vector<128x128xbf16>
    %cst_14 = arith.constant dense<0.000000e+00> : vector<16x128xf32>
    %18 = tpu.matmul %16, %17, %cst_14 {dimension_numbers = #tpu.dot_dimension_numbers<[1], [0], [0], [1], [0, 0, 1, 1], [], []>} : vector<16x128xbf16>, vector<128x128xbf16>, vector<16x128xf32> -> vector<16x128xf32>
    %c0_15 = arith.constant 0 : index
    %c0_16 = arith.constant 0 : index
    %19 = vector.load %arg7[%c0_15, %c0_16] : memref<1x128xf32, #tpu.memory_space<vmem>>, vector<1x128xf32>
    %20 = vector.broadcast %19 : vector<1x128xf32> to vector<16x128xf32>
    %21 = arith.addf %18, %20 : vector<16x128xf32>
    %22 = arith.truncf %21 : vector<16x128xf32> to vector<16x128xbf16>
    %cst_17 = arith.constant 0.000000e+00 : bf16
    %23 = vector.broadcast %cst_17 : bf16 to vector<16x128xbf16>
    %24 = arith.maximumf %22, %23 : vector<16x128xbf16>
    %c0_18 = arith.constant 0 : index
    %c0_19 = arith.constant 0 : index
    %25 = vector.load %arg8[%c0_18, %c0_19] : memref<128x128xbf16, #tpu.memory_space<vmem>>, vector<128x128xbf16>
    %cst_20 = arith.constant dense<0.000000e+00> : vector<16x128xf32>
    %26 = tpu.matmul %24, %25, %cst_20 {dimension_numbers = #tpu.dot_dimension_numbers<[1], [0], [0], [1], [0, 0, 1, 1], [], []>} : vector<16x128xbf16>, vector<128x128xbf16>, vector<16x128xf32> -> vector<16x128xf32>
    %c0_21 = arith.constant 0 : index
    %c0_22 = arith.constant 0 : index
    %27 = vector.load %arg9[%c0_21, %c0_22] : memref<1x128xf32, #tpu.memory_space<vmem>>, vector<1x128xf32>
    %28 = vector.broadcast %27 : vector<1x128xf32> to vector<16x128xf32>
    %29 = arith.addf %26, %28 : vector<16x128xf32>
    %30 = arith.truncf %29 : vector<16x128xf32> to vector<16x128xbf16>
    %cst_23 = arith.constant 0.000000e+00 : bf16
    %31 = vector.broadcast %cst_23 : bf16 to vector<16x128xbf16>
    %32 = arith.maximumf %30, %31 : vector<16x128xbf16>
    %c0_24 = arith.constant 0 : index
    %c0_25 = arith.constant 0 : index
    %33 = vector.load %arg10[%c0_24, %c0_25] : memref<128x128xbf16, #tpu.memory_space<vmem>>, vector<128x128xbf16>
    %cst_26 = arith.constant dense<0.000000e+00> : vector<16x128xf32>
    %34 = tpu.matmul %32, %33, %cst_26 {dimension_numbers = #tpu.dot_dimension_numbers<[1], [0], [0], [1], [0, 0, 1, 1], [], []>} : vector<16x128xbf16>, vector<128x128xbf16>, vector<16x128xf32> -> vector<16x128xf32>
    %c0_27 = arith.constant 0 : index
    %c0_28 = arith.constant 0 : index
    %35 = vector.load %arg11[%c0_27, %c0_28] : memref<1x128xf32, #tpu.memory_space<vmem>>, vector<1x128xf32>
    %36 = vector.broadcast %35 : vector<1x128xf32> to vector<16x128xf32>
    %37 = arith.addf %34, %36 : vector<16x128xf32>
    %38 = arith.truncf %37 : vector<16x128xf32> to vector<16x128xbf16>
    %cst_29 = arith.constant 0.000000e+00 : bf16
    %39 = vector.broadcast %cst_29 : bf16 to vector<16x128xbf16>
    %40 = arith.maximumf %38, %39 : vector<16x128xbf16>
    %c0_30 = arith.constant 0 : index
    %c0_31 = arith.constant 0 : index
    %41 = vector.load %arg12[%c0_30, %c0_31] : memref<128x128xbf16, #tpu.memory_space<vmem>>, vector<128x128xbf16>
    %cst_32 = arith.constant dense<0.000000e+00> : vector<16x128xf32>
    %42 = tpu.matmul %40, %41, %cst_32 {dimension_numbers = #tpu.dot_dimension_numbers<[1], [0], [0], [1], [0, 0, 1, 1], [], []>} : vector<16x128xbf16>, vector<128x128xbf16>, vector<16x128xf32> -> vector<16x128xf32>
    %c0_33 = arith.constant 0 : index
    %c0_34 = arith.constant 0 : index
    %43 = vector.load %arg13[%c0_33, %c0_34] : memref<1x128xf32, #tpu.memory_space<vmem>>, vector<1x128xf32>
    %44 = vector.broadcast %43 : vector<1x128xf32> to vector<16x128xf32>
    %45 = arith.addf %42, %44 : vector<16x128xf32>
    %46 = arith.truncf %45 : vector<16x128xf32> to vector<16x128xbf16>
    %cst_35 = arith.constant 0.000000e+00 : bf16
    %47 = vector.broadcast %cst_35 : bf16 to vector<16x128xbf16>
    %48 = arith.maximumf %46, %47 : vector<16x128xbf16>
    %c0_36 = arith.constant 0 : index
    %c0_37 = arith.constant 0 : index
    %49 = vector.load %arg14[%c0_36, %c0_37] : memref<128x128xbf16, #tpu.memory_space<vmem>>, vector<128x128xbf16>
    %cst_38 = arith.constant dense<0.000000e+00> : vector<16x128xf32>
    %50 = tpu.matmul %48, %49, %cst_38 {dimension_numbers = #tpu.dot_dimension_numbers<[1], [0], [0], [1], [0, 0, 1, 1], [], []>} : vector<16x128xbf16>, vector<128x128xbf16>, vector<16x128xf32> -> vector<16x128xf32>
    %c0_39 = arith.constant 0 : index
    %c0_40 = arith.constant 0 : index
    %51 = vector.load %arg15[%c0_39, %c0_40] : memref<1x128xf32, #tpu.memory_space<vmem>>, vector<1x128xf32>
    %52 = vector.broadcast %51 : vector<1x128xf32> to vector<16x128xf32>
    %53 = arith.addf %50, %52 : vector<16x128xf32>
    %54 = arith.truncf %53 : vector<16x128xf32> to vector<16x128xbf16>
    %c0_41 = arith.constant 0 : index
    %c0_42 = arith.constant 0 : index
    %55 = vector.load %arg16[%c0_41, %c0_42] : memref<16x128xbf16, #tpu.memory_space<vmem>>, vector<16x128xbf16>
    tpu.vector_store %arg16[%c0_41, %c0_42], %54 {strides = array<i32>} : memref<16x128xbf16, #tpu.memory_space<vmem>>, vector<16x128xbf16>,
    return
  }
  func.func @transform_0(%arg0: i32) -> (i32, i32) {
    %c0_i32 = arith.constant 0 : i32
    %c0_i32_0 = arith.constant 0 : i32
    return %arg0, %c0_i32 : i32, i32
  }
  func.func @transform_1(%arg0: i32) -> (i32, i32) {
    %c0_i32 = arith.constant 0 : i32
    %c0_i32_0 = arith.constant 0 : i32
    %c0_i32_1 = arith.constant 0 : i32
    return %c0_i32, %c0_i32_0 : i32, i32
  }
  func.func @transform_2(%arg0: i32) -> (i32, i32) {
    %c0_i32 = arith.constant 0 : i32
    %c0_i32_0 = arith.constant 0 : i32
    %c0_i32_1 = arith.constant 0 : i32
    return %c0_i32, %c0_i32_0 : i32, i32
  }
  func.func @transform_3(%arg0: i32) -> (i32, i32) {
    %c0_i32 = arith.constant 0 : i32
    %c0_i32_0 = arith.constant 0 : i32
    %c0_i32_1 = arith.constant 0 : i32
    return %c0_i32, %c0_i32_0 : i32, i32
  }
  func.func @transform_4(%arg0: i32) -> (i32, i32) {
    %c0_i32 = arith.constant 0 : i32
    %c0_i32_0 = arith.constant 0 : i32
    %c0_i32_1 = arith.constant 0 : i32
    return %c0_i32, %c0_i32_0 : i32, i32
  }
  func.func @transform_5(%arg0: i32) -> (i32, i32) {
    %c0_i32 = arith.constant 0 : i32
    %c0_i32_0 = arith.constant 0 : i32
    %c0_i32_1 = arith.constant 0 : i32
    return %c0_i32, %c0_i32_0 : i32, i32
  }
  func.func @transform_6(%arg0: i32) -> (i32, i32) {
    %c0_i32 = arith.constant 0 : i32
    %c0_i32_0 = arith.constant 0 : i32
    %c0_i32_1 = arith.constant 0 : i32
    return %c0_i32, %c0_i32_0 : i32, i32
  }
  func.func @transform_7(%arg0: i32) -> (i32, i32) {
    %c0_i32 = arith.constant 0 : i32
    %c0_i32_0 = arith.constant 0 : i32
    %c0_i32_1 = arith.constant 0 : i32
    return %c0_i32, %c0_i32_0 : i32, i32
  }
  func.func @transform_8(%arg0: i32) -> (i32, i32) {
    %c0_i32 = arith.constant 0 : i32
    %c0_i32_0 = arith.constant 0 : i32
    %c0_i32_1 = arith.constant 0 : i32
    return %c0_i32, %c0_i32_0 : i32, i32
  }
  func.func @transform_9(%arg0: i32) -> (i32, i32) {
    %c0_i32 = arith.constant 0 : i32
    %c0_i32_0 = arith.constant 0 : i32
    %c0_i32_1 = arith.constant 0 : i32
    return %c0_i32, %c0_i32_0 : i32, i32
  }
  func.func @transform_10(%arg0: i32) -> (i32, i32) {
    %c0_i32 = arith.constant 0 : i32
    %c0_i32_0 = arith.constant 0 : i32
    %c0_i32_1 = arith.constant 0 : i32
    return %c0_i32, %c0_i32_0 : i32, i32
  }
  func.func @transform_11(%arg0: i32) -> (i32, i32) {
    %c0_i32 = arith.constant 0 : i32
    %c0_i32_0 = arith.constant 0 : i32
    %c0_i32_1 = arith.constant 0 : i32
    return %c0_i32, %c0_i32_0 : i32, i32
  }
  func.func @transform_12(%arg0: i32) -> (i32, i32) {
    %c0_i32 = arith.constant 0 : i32
    %c0_i32_0 = arith.constant 0 : i32
    %c0_i32_1 = arith.constant 0 : i32
    return %c0_i32, %c0_i32_0 : i32, i32
  }
  func.func @transform_13(%arg0: i32) -> (i32, i32) {
    %c0_i32 = arith.constant 0 : i32
    %c0_i32_0 = arith.constant 0 : i32
    %c0_i32_1 = arith.constant 0 : i32
    return %c0_i32, %c0_i32_0 : i32, i32
  }
  func.func @transform_14(%arg0: i32) -> (i32, i32) {
    %c0_i32 = arith.constant 0 : i32
    %c0_i32_0 = arith.constant 0 : i32
    %c0_i32_1 = arith.constant 0 : i32
    return %c0_i32, %c0_i32_0 : i32, i32
  }
  func.func @transform_15(%arg0: i32) -> (i32, i32) {
    %c0_i32 = arith.constant 0 : i32
    %c0_i32_0 = arith.constant 0 : i32
    return %arg0, %c0_i32 : i32, i32
  }
}

</mosaic_0001>

<bundles_post_ra>
// kernel: autoencoder_forward.1
= control target key start
LH: loop header
LB: loop body
LE: loop exit
PB: predicated region body
PF: predicated region fallthrough
CT: control target
= control target key end

     0   :  { %20 = vsyncpa [#allocation3], 0  ;;  %s1905_s0 = inlined_call_operand.vmem [shape: bf16[16,128], index: 0, kind: input, shape index: {}]   ;;  %s1906_s1 = inlined_call_operand.hbm [shape: bf16[128,128], index: 1, kind: input, shape index: {}]   ;;  %s1907_s2 = inlined_call_operand.vmem [shape: f32[1,128], index: 2, kind: input, shape index: {}]   ;;  %s1908_s3 = inlined_call_operand.hbm [shape: bf16[128,128], index: 3, kind: input, shape index: {}]   ;;  %s1909_s4 = inlined_call_operand.vmem [shape: f32[1,128], index: 4, kind: input, shape index: {}]   ;;  %s1910_s5 = inlined_call_operand.hbm [shape: bf16[128,128], index: 5, kind: input, shape index: {}]   ;;  %s1911_s6 = inlined_call_operand.hbm [shape: f32[1,128], index: 6, kind: input, shape index: {}]   ;;  %s1912_s7 = inlined_call_operand.hbm [shape: bf16[128,128], index: 7, kind: input, shape index: {}]   ;;  %s1913_s8 = inlined_call_operand.hbm [shape: f32[1,128], index: 8, kind: input, shape index: {}]   ;;  %s1914_s9 = inlined_call_operand.hbm [shape: bf16[128,128], index: 9, kind: input, shape index: {}]   ;;  %s1915_s10 = inlined_call_operand.hbm [shape: f32[1,128], index: 10, kind: input, shape index: {}]   ;;  %s1916_s11 = inlined_call_operand.vmem [shape: bf16[128,128], index: 11, kind: input, shape index: {}]   ;;  %s1917_s12 = inlined_call_operand.vmem [shape: f32[1,128], index: 12, kind: input, shape index: {}]   ;;  %s1918_s13 = inlined_call_operand.hbm [shape: bf16[128,128], index: 13, kind: input, shape index: {}]   ;;  %s1919_s14 = inlined_call_operand.vmem [shape: f32[1,128], index: 14, kind: input, shape index: {}]   ;;  %s1920_s15 = inlined_call_operand.vmem [shape: bf16[16,128], index: 15, kind: output, shape index: {}]  }
   0x1   :  { %21 = vsyncpa [#allocation5], 0 }
   0x2   :  { %22 = vsyncpa [#allocation8], 0 }
   0x3   :  { %23 = vsyncpa [#allocation11], 0 }
   0x4   :  { %24 = vsyncpa [#allocation14], 0  ;;  %s1545_s18 = smov [#allocation4]   ;;  %s1546_s20 = smov [#allocation7]  }
   0x5   :  { %s46_s19 = sshll.u32 %s1545_s18, 4  ;;  %s73_s21 = sshll.u32 %s1546_s20, 4  ;;  %s47_s19 = int_to_ptr.vmem [resolvable:$true] %s46_s19  ;;  %s1639_s21 = int_to_ptr.vmem [resolvable:$true] %s73_s21 }
   0x6   :  { %s1337_s24 = scalar_lea.hbm %s1908_s3, 1024 }
   0x7   :  { %p1338_p0 = scmp.ne.s32.totalorder %s1908_s3, %s1337_s24  ;;  %p1341_p1 = scmp.lt.u32.totalorder %s1337_s24, %s1908_s3 }
   0x9   :  { %p1343_p2 = pnand %p1341_p1, %p1338_p0 }
   0xb   :  { %1346 = shalt.err (!%p1343_p2)
}
   0xc   :  { %s1347_s29 = scalar_lea.vmem %s47_s19, 1024  ;;  %p1352_p4 = scmp.lt.s32.totalorder %s47_s19, %s47_s19 }
   0xd   :  { %p1348_p3 = scmp.ne.s32.totalorder %s47_s19, %s1347_s29  ;;  %p1353_p5 = scmp.lt.s32.totalorder %s1347_s29, %s1347_s29 }
   0xf   :  { %p1354_p6 = por %p1353_p5, %p1352_p4 }
  0x11   :  { %p1355_p7 = pnand %p1354_p6, %p1348_p3 }
  0x13   :  { %1358 = shalt.err (!%p1355_p7)
}
  0x14   :  { %s1547_s30 = smov 64   ;;  %s1548_s16 = smov 4  }
  0x15   :  { %52 = dma.hbm_to_vmem [thread:$0]  %s1908_s3, 1024, %s47_s19, [#allocation5], %s1547_s30, %s1547_s30, %s1548_s16  }
  0x16   :  { %s1359_s23 = scalar_lea.hbm %s1911_s6, 16 }
  0x17   :  { %p1360_p8 = scmp.ne.s32.totalorder %s1911_s6, %s1359_s23  ;;  %p1363_p9 = scmp.lt.u32.totalorder %s1359_s23, %s1911_s6 }
  0x19   :  { %p1365_p10 = pnand %p1363_p9, %p1360_p8 }
  0x1b   :  { %1368 = shalt.err (!%p1365_p10)
}
  0x1c   :  { %s1369_s28 = scalar_lea.vmem %s1639_s21, 16  ;;  %s1373_s3 = scalar_lea.vmem %s1639_s21, 32 }
  0x1d   :  { %p1370_p11 = scmp.ne.s32.totalorder %s1639_s21, %s1369_s28  ;;  %p1374_p12 = scmp.lt.s32.totalorder %s1639_s21, %s1639_s21 }
  0x1e   :  { %p1375_p13 = scmp.lt.s32.totalorder %s1373_s3, %s1369_s28 }
  0x20   :  { %p1376_p0 = por %p1375_p13, %p1374_p12 }
  0x22   :  { %p1377_p1 = pnand %p1376_p0, %p1370_p11 }
  0x24   :  { %1380 = shalt.err (!%p1377_p1)
}
  0x25   :  { %76 = dma.hbm_to_vmem [thread:$0]  %s1911_s6, 16, %s1639_s21, [#allocation8]  }
  0x26   :  { %s1549_s17 = smov [#allocation10]   ;;  %s1550_s20 = smov [#allocation13]  }
  0x27   :  { %s95_s18 = sshll.u32 %s1549_s17, 4  ;;  %s117_s22 = sshll.u32 %s1550_s20, 4  ;;  %s96_s18 = int_to_ptr.vmem [resolvable:$true] %s95_s18  ;;  %s118_s22 = int_to_ptr.vmem [resolvable:$true] %s117_s22 }
  0x28   :  { %s1381_s25 = scalar_lea.hbm %s1913_s8, 16 }
  0x29   :  { %p1382_p2 = scmp.ne.s32.totalorder %s1913_s8, %s1381_s25  ;;  %p1385_p3 = scmp.lt.u32.totalorder %s1381_s25, %s1913_s8 }
  0x2b   :  { %p1387_p4 = pnand %p1385_p3, %p1382_p2 }
  0x2d   :  { %1390 = shalt.err (!%p1387_p4)
}
  0x2e   :  { %s1391_s6 = scalar_lea.vmem %s96_s18, 16  ;;  %s1395_s21 = scalar_lea.vmem %s96_s18, 32 }
  0x2f   :  { %p1392_p5 = scmp.ne.s32.totalorder %s96_s18, %s1391_s6  ;;  %p1396_p6 = scmp.lt.s32.totalorder %s96_s18, %s96_s18 }
  0x30   :  { %p1397_p7 = scmp.lt.s32.totalorder %s1395_s21, %s1391_s6 }
  0x32   :  { %p1398_p8 = por %p1397_p7, %p1396_p6 }
  0x34   :  { %p1399_p9 = pnand %p1398_p8, %p1392_p5 }
  0x36   :  { %1402 = shalt.err (!%p1399_p9)
}
  0x37   :  { %98 = dma.hbm_to_vmem [thread:$0]  %s1913_s8, 16, %s96_s18, [#allocation11]  }
  0x38   :  { %s1403_s23 = scalar_lea.hbm %s1915_s10, 16 }
  0x39   :  { %p1404_p10 = scmp.ne.s32.totalorder %s1915_s10, %s1403_s23  ;;  %p1407_p11 = scmp.lt.u32.totalorder %s1403_s23, %s1915_s10 }
  0x3b   :  { %p1409_p12 = pnand %p1407_p11, %p1404_p10 }
  0x3d   :  { %1412 = shalt.err (!%p1409_p12)
}
  0x3e   :  { %s1413_s28 = scalar_lea.vmem %s118_s22, 16  ;;  %s1417_s3 = scalar_lea.vmem %s118_s22, 32 }
  0x3f   :  { %p1414_p13 = scmp.ne.s32.totalorder %s118_s22, %s1413_s28  ;;  %p1418_p0 = scmp.lt.s32.totalorder %s118_s22, %s118_s22 }
  0x40   :  { %p1419_p1 = scmp.lt.s32.totalorder %s1417_s3, %s1413_s28 }
  0x42   :  { %p1420_p2 = por %p1419_p1, %p1418_p0 }
  0x44   :  { %p1421_p3 = pnand %p1420_p2, %p1414_p13 }
  0x46   :  { %1424 = shalt.err (!%p1421_p3)
}
  0x47   :  { %120 = dma.hbm_to_vmem [thread:$0]  %s1915_s10, 16, %s118_s22, [#allocation14]  }
  0x48   :  { %s1551_s6 = smov [#allocation2]   ;;  %s1552_s19 = smov [#allocation6]  }
  0x49   :  { %s32_s21 = sshll.u32 %s1551_s6, 4  ;;  %s60_s29 = sshll.u32 %s1552_s19, 4  ;;  %s33_s21 = int_to_ptr.vmem [resolvable:$true] %s32_s21  ;;  %s1698_s29 = int_to_ptr.vmem [resolvable:$true] %s60_s29 }
  0x4a   :  { %s1425_s23 = scalar_lea.hbm %s1906_s1, 1024 }
  0x4b   :  { %p1426_p4 = scmp.ne.s32.totalorder %s1906_s1, %s1425_s23  ;;  %p1429_p5 = scmp.lt.u32.totalorder %s1425_s23, %s1906_s1 }
  0x4d   :  { %p1431_p6 = pnand %p1429_p5, %p1426_p4 }
  0x4f   :  { %1434 = shalt.err (!%p1431_p6)
}
  0x50   :  { %s1435_s10 = scalar_lea.vmem %s33_s21, 1024  ;;  %p1440_p8 = scmp.lt.s32.totalorder %s33_s21, %s33_s21 }
  0x51   :  { %p1436_p7 = scmp.ne.s32.totalorder %s33_s21, %s1435_s10  ;;  %p1441_p9 = scmp.lt.s32.totalorder %s1435_s10, %s1435_s10 }
  0x53   :  { %p1442_p10 = por %p1441_p9, %p1440_p8 }
  0x55   :  { %p1443_p11 = pnand %p1442_p10, %p1436_p7 }
  0x57   :  { %1446 = shalt.err (!%p1443_p11)
}
  0x58   :  { %38 = dma.hbm_to_vmem [thread:$0]  %s1906_s1, 1024, %s33_s21, [#allocation3], %s1547_s30, %s1547_s30, %s1548_s16  }
  0x59   :  { %s1447_s18 = scalar_lea.hbm %s1910_s5, 1024 }
  0x5a   :  { %p1448_p12 = scmp.ne.s32.totalorder %s1910_s5, %s1447_s18  ;;  %p1451_p13 = scmp.lt.u32.totalorder %s1447_s18, %s1910_s5 }
  0x5c   :  { %p1453_p0 = pnand %p1451_p13, %p1448_p12 }
  0x5e   :  { %1456 = shalt.err (!%p1453_p0)
}
  0x5f   :  { %s1457_s23 = scalar_lea.vmem %s1698_s29, 1024  ;;  %p1462_p2 = scmp.lt.s32.totalorder %s1698_s29, %s1698_s29 }
  0x60   :  { %p1458_p1 = scmp.ne.s32.totalorder %s1698_s29, %s1457_s23  ;;  %p1463_p3 = scmp.lt.s32.totalorder %s1457_s23, %s1457_s23 }
  0x62   :  { %p1464_p4 = por %p1463_p3, %p1462_p2 }
  0x64   :  { %p1465_p5 = pnand %p1464_p4, %p1458_p1 }
  0x66   :  { %1468 = shalt.err (!%p1465_p5)
}
  0x67   :  { %66 = dma.hbm_to_vmem [thread:$0]  %s1910_s5, 1024, %s1698_s29, [#allocation5], %s1547_s30, %s1547_s30, %s1548_s16  }
  0x68   :  { %s1553_s24 = smov [#allocation9]   ;;  %s1554_s26 = smov [#allocation12]  }
  0x69   :  { %s82_s25 = sshll.u32 %s1553_s24, 4  ;;  %s104_s27 = sshll.u32 %s1554_s26, 4  ;;  %s83_s25 = int_to_ptr.vmem [resolvable:$true] %s82_s25  ;;  %s1735_s27 = int_to_ptr.vmem [resolvable:$true] %s104_s27 }
  0x6a   :  { %s1469_s28 = scalar_lea.hbm %s1912_s7, 1024 }
  0x6b   :  { %p1470_p6 = scmp.ne.s32.totalorder %s1912_s7, %s1469_s28  ;;  %p1473_p7 = scmp.lt.u32.totalorder %s1469_s28, %s1912_s7 }
  0x6d   :  { %p1475_p8 = pnand %p1473_p7, %p1470_p6 }
  0x6f   :  { %1478 = shalt.err (!%p1475_p8)
}
  0x70   :  { %s1479_s5 = scalar_lea.vmem %s83_s25, 1024  ;;  %p1484_p10 = scmp.lt.s32.totalorder %s83_s25, %s83_s25 }
  0x71   :  { %p1480_p9 = scmp.ne.s32.totalorder %s83_s25, %s1479_s5  ;;  %p1485_p11 = scmp.lt.s32.totalorder %s1479_s5, %s1479_s5 }
  0x73   :  { %p1486_p12 = por %p1485_p11, %p1484_p10 }
  0x75   :  { %p1487_p13 = pnand %p1486_p12, %p1480_p9 }
  0x77   :  { %1490 = shalt.err (!%p1487_p13)
}
  0x78   :  { %88 = dma.hbm_to_vmem [thread:$0]  %s1912_s7, 1024, %s83_s25, [#allocation8], %s1547_s30, %s1547_s30, %s1548_s16  }
  0x79   :  { %s1491_s23 = scalar_lea.hbm %s1914_s9, 1024 }
  0x7a   :  { %p1492_p0 = scmp.ne.s32.totalorder %s1914_s9, %s1491_s23  ;;  %p1495_p1 = scmp.lt.u32.totalorder %s1491_s23, %s1914_s9 }
  0x7c   :  { %p1497_p2 = pnand %p1495_p1, %p1492_p0 }
  0x7e   :  { %1500 = shalt.err (!%p1497_p2)
}
  0x7f   :  { %s1501_s10 = scalar_lea.vmem %s1735_s27, 1024  ;;  %p1506_p4 = scmp.lt.s32.totalorder %s1735_s27, %s1735_s27 }
  0x80   :  { %p1502_p3 = scmp.ne.s32.totalorder %s1735_s27, %s1501_s10  ;;  %p1507_p5 = scmp.lt.s32.totalorder %s1501_s10, %s1501_s10 }
  0x82   :  { %p1508_p6 = por %p1507_p5, %p1506_p4 }
  0x84   :  { %p1509_p7 = pnand %p1508_p6, %p1502_p3 }
  0x86   :  { %1512 = shalt.err (!%p1509_p7)
}
  0x87   :  { %110 = dma.hbm_to_vmem [thread:$0]  %s1914_s9, 1024, %s1735_s27, [#allocation11], %s1547_s30, %s1547_s30, %s1548_s16  }
  0x88   :  { %s1555_s22 = smov [#allocation15]   ;;  %s1513_s18 = scalar_lea.hbm %s1918_s13, 1024 }
  0x89   :  { %s130_s28 = sshll.u32 %s1555_s22, 4  ;;  %p1514_p8 = scmp.ne.s32.totalorder %s1918_s13, %s1513_s18  ;;  %s131_s28 = int_to_ptr.vmem [resolvable:$true] %s130_s28 }
  0x8a   :  { %p1517_p9 = scmp.lt.u32.totalorder %s1513_s18, %s1918_s13 }
  0x8c   :  { %p1519_p10 = pnand %p1517_p9, %p1514_p8 }
  0x8e   :  { %1522 = shalt.err (!%p1519_p10)
}
  0x8f   :  { %s1523_s17 = scalar_lea.vmem %s131_s28, 1024  ;;  %p1528_p12 = scmp.lt.s32.totalorder %s131_s28, %s131_s28 }
  0x90   :  { %p1524_p11 = scmp.ne.s32.totalorder %s131_s28, %s1523_s17  ;;  %p1529_p13 = scmp.lt.s32.totalorder %s1523_s17, %s1523_s17 }
  0x92   :  { %p1530_p0 = por %p1529_p13, %p1528_p12 }
  0x94   :  { %p1531_p1 = pnand %p1530_p0, %p1524_p11 }
  0x96   :  { %1534 = shalt.err (!%p1531_p1)
}
  0x97   :  { %136 = dma.hbm_to_vmem [thread:$0]  %s1918_s13, 1024, %s131_s28, [#allocation14], %s1547_s30, %s1547_s30, %s1548_s16  }
  0x98   :  { %1535 = dma.done.wait [#allocation3], 1024  }
  0x99   :  { %1536 = vsyncadd [#allocation3], 4294966272 }
  0x9a   :  { %1537 = dma.done.wait [#allocation5], 2048  }
  0x9b   :  { %1538 = vsyncadd [#allocation5], 4294965248 }
  0x9c   :  { %1539 = dma.done.wait [#allocation8], 1040  }
  0x9d   :  { %1540 = vsyncadd [#allocation8], 4294966256 }
  0x9e   :  { %1541 = dma.done.wait [#allocation11], 1040  }
  0x9f   :  { %1542 = vsyncadd [#allocation11], 4294966256 }
  0xa0   :  { %1543 = dma.done.wait [#allocation14], 1040  }
  0xa1   :  { %1544 = vsyncadd [#allocation14], 4294966256  ;;  %v1556_v0 = vmov 0.0   ;;  %vm1557_vm0 = vmmov 0   ;;  %v1280_v1 = vld [vmem:[#allocation2] sm:$0xff]   ;;  %v1281_v2 = vld [vmem:[#allocation2 + $0x8] sm:$0xff]  }
  0xa2   :  { %1126 = vmatprep.subr.bf16.mxu0 %v1556_v0  ;;  %1142 = vmatprep.mubr.msk.bf16.mxu0 %vm1557_vm0, %v1556_v0  ;;  %v1282_v3 = vld [vmem:[#allocation2 + $0x10] sm:$0xff]   ;;  %v1289_v4 = vld [vmem:[#allocation4] sm:$0xff]   ;;  %v1283_v5 = vld [vmem:[#allocation2 + $0x18] sm:$0xff]   ;;  %v1558_v32 = vmov 0  }
  0xa3   :  { %1146 = vmatprep.subr.bf16.mxu1 %v1556_v0  ;;  %1162 = vmatprep.mubr.msk.bf16.mxu1 %vm1557_vm0, %v1556_v0  ;;  %v1290_v6 = vld [vmem:[#allocation4 + $0x8] sm:$0xff]   ;;  %v1284_v7 = vld [vmem:[#allocation2 + $0x20] sm:$0xff]   ;;  %v1291_v8 = vld [vmem:[#allocation4 + $0x10] sm:$0xff]  }
  0xa4   :  { %1127 = vmatpush3.bf16.msra.mxu0 %v1280_v1  ;;  %1147 = vmatpush3.bf16.msra.mxu1 %v1289_v4  ;;  %v1285_v9 = vld [vmem:[#allocation2 + $0x28] sm:$0xff]   ;;  %v1292_v10 = vld [vmem:[#allocation4 + $0x18] sm:$0xff]   ;;  %v1286_v11 = vld [vmem:[#allocation2 + $0x30] sm:$0xff]  }
  0xa5   :  { %1128 = vmatprep.subr.bf16.mxu0 %v1556_v0  ;;  %1148 = vmatprep.subr.bf16.mxu1 %v1556_v0  ;;  %v1293_v12 = vld [vmem:[#allocation4 + $0x20] sm:$0xff]   ;;  %v1287_v13 = vld [vmem:[#allocation2 + $0x38] sm:$0xff]   ;;  %v1294_v14 = vld [vmem:[#allocation4 + $0x28] sm:$0xff]  }
  0xa6   :  { %v1288_v15 = vld [vmem:[%s1905_s0] sm:$0xff]   ;;  %v1295_v16 = vld [vmem:[#allocation4 + $0x30] sm:$0xff]   ;;  %v1296_v17 = vld [vmem:[#allocation4 + $0x38] sm:$0xff]  }
  0xa7   :  { %v1297_v18 = vld [vmem:[#allocation6] sm:$0xff]   ;;  %v1298_v19 = vld [vmem:[#allocation6 + $0x8] sm:$0xff]   ;;  %v1299_v20 = vld [vmem:[#allocation6 + $0x10] sm:$0xff]  }
  0xa8   :  { %1129 = vmatpush3.bf16.msra.mxu0 %v1281_v2  ;;  %1149 = vmatpush3.bf16.msra.mxu1 %v1290_v6  ;;  %v1300_v21 = vld [vmem:[#allocation6 + $0x18] sm:$0xff]   ;;  %v1301_v22 = vld [vmem:[#allocation6 + $0x20] sm:$0xff]   ;;  %v1302_v23 = vld [vmem:[#allocation6 + $0x28] sm:$0xff]  }
  0xa9   :  { %1130 = vmatprep.subr.bf16.mxu0 %v1556_v0  ;;  %1150 = vmatprep.subr.bf16.mxu1 %v1556_v0  ;;  %v990_v24 = vld [vmem:[%s1907_s2] ss:$0 sm:$0xff]  ;;  %v1303_v34 = vld [vmem:[#allocation6 + $0x30] sm:$0xff]   ;;  %v1304_v35 = vld [vmem:[#allocation6 + $0x38] sm:$0xff]  }
  0xaa   :  { %v1305_v36 = vld [vmem:[#allocation9] sm:$0xff]   ;;  %v1306_v37 = vld [vmem:[#allocation9 + $0x8] sm:$0xff]   ;;  %v1307_v38 = vld [vmem:[#allocation9 + $0x10] sm:$0xff]  }
  0xab   :  { %v1308_v39 = vld [vmem:[#allocation9 + $0x18] sm:$0xff]   ;;  %v1309_v40 = vld [vmem:[#allocation9 + $0x20] sm:$0xff]   ;;  %v1310_v41 = vld [vmem:[#allocation9 + $0x28] sm:$0xff]  }
  0xac   :  { %1131 = vmatpush3.bf16.msra.mxu0 %v1282_v3  ;;  %1151 = vmatpush3.bf16.msra.mxu1 %v1291_v8  ;;  %v1000_v42 = vld [vmem:[%s1909_s4] ss:$0 sm:$0xff]  ;;  %v1311_v51 = vld [vmem:[#allocation9 + $0x30] sm:$0xff]   ;;  %v1313_v53 = vld [vmem:[#allocation12] sm:$0xff]  }
  0xad   :  { %1132 = vmatprep.subr.bf16.mxu0 %v1556_v0  ;;  %1152 = vmatprep.subr.bf16.mxu1 %v1556_v0  ;;  %v1312_v52 = vld [vmem:[#allocation9 + $0x38] sm:$0xff]   ;;  %v1314_v54 = vld [vmem:[#allocation12 + $0x8] sm:$0xff]   ;;  %v1317_v57 = vld [vmem:[#allocation12 + $0x20] sm:$0xff]  }
  0xae   :  { %v1315_v55 = vld [vmem:[#allocation12 + $0x10] sm:$0xff]   ;;  %v1316_v56 = vld [vmem:[#allocation12 + $0x18] sm:$0xff]   ;;  %v1318_v58 = vld [vmem:[#allocation12 + $0x28] sm:$0xff]  }
  0xaf   :  { %v1009_v59 = vld [vmem:[#allocation7] ss:$0 sm:$0xff]  ;;  %v1322_v8 = vld [vmem:[%s1916_s11 + $0x8] sm:$0xff]  }
  0xb0   :  { %1133 = vmatpush3.bf16.msra.mxu0 %v1283_v5  ;;  %1153 = vmatpush3.bf16.msra.mxu1 %v1292_v10  ;;  %v1319_v5 = vld [vmem:[#allocation12 + $0x30] sm:$0xff]   ;;  %v1320_v6 = vld [vmem:[#allocation12 + $0x38] sm:$0xff]  }
  0xb1   :  { %1134 = vmatprep.subr.bf16.mxu0 %v1556_v0  ;;  %1154 = vmatprep.subr.bf16.mxu1 %v1556_v0  ;;  %v1324_v10 = vld [vmem:[%s1916_s11 + $0x18] sm:$0xff]  }
  0xb4   :  { %1135 = vmatpush3.bf16.msra.mxu0 %v1284_v7  ;;  %1155 = vmatpush3.bf16.msra.mxu1 %v1293_v12  ;;  %v1321_v7 = vld [vmem:[%s1916_s11] sm:$0xff]   ;;  %v1326_v12 = vld [vmem:[%s1916_s11 + $0x28] sm:$0xff]  }
  0xb5   :  { %1136 = vmatprep.subr.bf16.mxu0 %v1556_v0  ;;  %1156 = vmatprep.subr.bf16.mxu1 %v1556_v0 }
  0xb8   :  { %1137 = vmatpush3.bf16.msra.mxu0 %v1285_v9  ;;  %1157 = vmatpush3.bf16.msra.mxu1 %v1294_v14  ;;  %v1323_v9 = vld [vmem:[%s1916_s11 + $0x10] sm:$0xff]  }
  0xb9   :  { %1138 = vmatprep.subr.bf16.mxu0 %v1556_v0  ;;  %1158 = vmatprep.subr.bf16.mxu1 %v1556_v0 }
  0xbc   :  { %1139 = vmatpush3.bf16.msra.mxu0 %v1286_v11  ;;  %1159 = vmatpush3.bf16.msra.mxu1 %v1295_v16  ;;  %v1325_v11 = vld [vmem:[%s1916_s11 + $0x20] sm:$0xff]  }
  0xbd   :  { %1140 = vmatprep.subr.bf16.mxu0 %v1556_v0  ;;  %1160 = vmatprep.subr.bf16.mxu1 %v1556_v0 }
  0xc0   :  { %1141 = vmatpush3.bf16.msra.mxu0 %v1287_v13  ;;  %1161 = vmatpush3.bf16.msra.mxu1 %v1296_v17  ;;  %v1018_v13 = vld [vmem:[#allocation10] ss:$0 sm:$0xff] }
  0xc1   :  { %1166 = vmatprep.subr.bf16.mxu0 %v1556_v0  ;;  %1186 = vmatprep.subr.bf16.mxu1 %v1556_v0 }
  0xc3   :  { %1143 = vmatmul.mubr.bf16.vlgmr.msra.gmra.mrb[0].mxu0 %v1288_v15 }
  0xc4   :  { %1182 = vmatprep.mubr.msk.bf16.mxu0 %vm1557_vm0, %v1556_v0  ;;  %1167 = vmatpush3.bf16.msra.mxu0 %v1297_v18 }
  0xc5   :  { %1168 = vmatprep.subr.bf16.mxu0 %v1556_v0 }
  0xc8   :  { %1169 = vmatpush3.bf16.msra.mxu0 %v1298_v19 }
  0xc9   :  { %1170 = vmatprep.subr.bf16.mxu0 %v1556_v0 }
  0xcc   :  { %1171 = vmatpush3.bf16.msra.mxu0 %v1299_v20 }
  0xcd   :  { %1172 = vmatprep.subr.bf16.mxu0 %v1556_v0 }
  0xd0   :  { %1173 = vmatpush3.bf16.msra.mxu0 %v1300_v21 }
  0xd1   :  { %1174 = vmatprep.subr.bf16.mxu0 %v1556_v0 }
  0xd4   :  { %1175 = vmatpush3.bf16.msra.mxu0 %v1301_v22  ;;  %v1327_v22 = vld [vmem:[%s1916_s11 + $0x30] sm:$0xff]  }
  0xd5   :  { %1176 = vmatprep.subr.bf16.mxu0 %v1556_v0 }
  0xd8   :  { %1177 = vmatpush3.bf16.msra.mxu0 %v1302_v23  ;;  %v1328_v23 = vld [vmem:[%s1916_s11 + $0x38] sm:$0xff]  }
  0xd9   :  { %1178 = vmatprep.subr.bf16.mxu0 %v1556_v0 }
  0xdc   :  { %1179 = vmatpush3.bf16.msra.mxu0 %v1303_v34 }
  0xdd   :  { %1180 = vmatprep.subr.bf16.mxu0 %v1556_v0 }
  0xe0   :  { %1181 = vmatpush3.bf16.msra.mxu0 %v1304_v35 }
  0xe1   :  { %1206 = vmatprep.subr.bf16.mxu0 %v1556_v0 }
 0x196   :  { %v280_v25 = vpop.f32.mrb[0].mxu0 }
 0x197   :  { %v1144_v26 = vpop.f32.mrb[1].mxu0  ;;  %v281_v28 = vadd.f32 %v990_v24, %v280_v25  ;;  %v1330_v25 = vld [vmem:[#allocation15 + $0x8] sm:$0xff]  }
 0x198   :  { %v283_v27 = vpop.f32.mrb[2].mxu0  ;;  %v1331_v26 = vld [vmem:[#allocation15 + $0x10] sm:$0xff]  }
 0x199   :  { %v284_v29 = vadd.f32 %v990_v24, %v283_v27  ;;  %v1145_v30 = vpop.f32.mrb[3].mxu0  ;;  %v1329_v24 = vld [vmem:[#allocation15] sm:$0xff]   ;;  %v1332_v27 = vld [vmem:[#allocation15 + $0x18] sm:$0xff]  }
 0x19a   :  { %v1027_v30 = vld [vmem:[#allocation13] ss:$0 sm:$0xff] }
 0x19b   :  { %v287_v31 = vpack.c.bf16 %v284_v29, %v281_v28  ;;  %v1333_v28 = vld [vmem:[#allocation15 + $0x20] sm:$0xff]   ;;  %v1334_v29 = vld [vmem:[#allocation15 + $0x28] sm:$0xff]  }
 0x19d   :  { %v288_v33 = vmax.bf16 %v1558_v32, %v287_v31 }
 0x19f   :  { %1163 = vmatmul.mubr.bf16.vlgmr.msra.gmra.mrb[0].mxu1 %v288_v33 }
 0x1a0   :  { %1202 = vmatprep.mubr.msk.bf16.mxu1 %vm1557_vm0, %v1556_v0  ;;  %1187 = vmatpush3.bf16.msra.mxu1 %v1305_v36 }
 0x1a1   :  { %1188 = vmatprep.subr.bf16.mxu1 %v1556_v0 }
 0x1a4   :  { %1189 = vmatpush3.bf16.msra.mxu1 %v1306_v37 }
 0x1a5   :  { %1190 = vmatprep.subr.bf16.mxu1 %v1556_v0 }
 0x1a8   :  { %1191 = vmatpush3.bf16.msra.mxu1 %v1307_v38 }
 0x1a9   :  { %1192 = vmatprep.subr.bf16.mxu1 %v1556_v0 }
 0x1ac   :  { %1193 = vmatpush3.bf16.msra.mxu1 %v1308_v39 }
 0x1ad   :  { %1194 = vmatprep.subr.bf16.mxu1 %v1556_v0 }
 0x1b0   :  { %1195 = vmatpush3.bf16.msra.mxu1 %v1309_v40  ;;  %v1335_v40 = vld [vmem:[#allocation15 + $0x30] sm:$0xff]  }
 0x1b1   :  { %1196 = vmatprep.subr.bf16.mxu1 %v1556_v0 }
 0x1b4   :  { %1197 = vmatpush3.bf16.msra.mxu1 %v1310_v41  ;;  %v1336_v41 = vld [vmem:[#allocation15 + $0x38] sm:$0xff]  }
 0x1b5   :  { %1198 = vmatprep.subr.bf16.mxu1 %v1556_v0 }
 0x1b8   :  { %1199 = vmatpush3.bf16.msra.mxu1 %v1311_v51 }
 0x1b9   :  { %1200 = vmatprep.subr.bf16.mxu1 %v1556_v0 }
 0x1bc   :  { %1201 = vmatpush3.bf16.msra.mxu1 %v1312_v52 }
 0x1bd   :  { %1226 = vmatprep.subr.bf16.mxu1 %v1556_v0 }
 0x272   :  { %v394_v43 = vpop.f32.mrb[0].mxu1 }
 0x273   :  { %v1164_v44 = vpop.f32.mrb[1].mxu1  ;;  %v395_v46 = vadd.f32 %v1000_v42, %v394_v43 }
 0x274   :  { %v397_v45 = vpop.f32.mrb[2].mxu1 }
 0x275   :  { %v398_v47 = vadd.f32 %v1000_v42, %v397_v45  ;;  %v1165_v48 = vpop.f32.mrb[3].mxu1  ;;  %v1036_v42 = vld [vmem:[%s1917_s12] ss:$0 sm:$0xff] }
 0x277   :  { %v401_v49 = vpack.c.bf16 %v398_v47, %v395_v46 }
 0x279   :  { %v402_v50 = vmax.bf16 %v1558_v32, %v401_v49 }
 0x27b   :  { %1183 = vmatmul.mubr.bf16.vlgmr.msra.gmra.mrb[4].mxu0 %v402_v50 }
 0x27c   :  { %1222 = vmatprep.mubr.msk.bf16.mxu0 %vm1557_vm0, %v1556_v0  ;;  %1207 = vmatpush3.bf16.msra.mxu0 %v1313_v53 }
 0x27d   :  { %1208 = vmatprep.subr.bf16.mxu0 %v1556_v0 }
 0x280   :  { %1209 = vmatpush3.bf16.msra.mxu0 %v1314_v54 }
 0x281   :  { %1210 = vmatprep.subr.bf16.mxu0 %v1556_v0 }
 0x284   :  { %1211 = vmatpush3.bf16.msra.mxu0 %v1315_v55 }
 0x285   :  { %1212 = vmatprep.subr.bf16.mxu0 %v1556_v0 }
 0x288   :  { %1213 = vmatpush3.bf16.msra.mxu0 %v1316_v56 }
 0x289   :  { %1214 = vmatprep.subr.bf16.mxu0 %v1556_v0 }
 0x28c   :  { %1215 = vmatpush3.bf16.msra.mxu0 %v1317_v57 }
 0x28d   :  { %1216 = vmatprep.subr.bf16.mxu0 %v1556_v0 }
 0x290   :  { %1217 = vmatpush3.bf16.msra.mxu0 %v1318_v58 }
 0x291   :  { %1218 = vmatprep.subr.bf16.mxu0 %v1556_v0 }
 0x294   :  { %1219 = vmatpush3.bf16.msra.mxu0 %v1319_v5 }
 0x295   :  { %1220 = vmatprep.subr.bf16.mxu0 %v1556_v0 }
 0x298   :  { %1221 = vmatpush3.bf16.msra.mxu0 %v1320_v6 }
 0x299   :  { %1246 = vmatprep.subr.bf16.mxu0 %v1556_v0 }
 0x34e   :  { %v508_v60 = vpop.f32.mrb[4].mxu0 }
 0x34f   :  { %v1184_v61 = vpop.f32.mrb[5].mxu0  ;;  %v509_v63 = vadd.f32 %v1009_v59, %v508_v60 }
 0x350   :  { %v511_v62 = vpop.f32.mrb[6].mxu0 }
 0x351   :  { %v512_v1 = vadd.f32 %v1009_v59, %v511_v62  ;;  %v1185_v2 = vpop.f32.mrb[7].mxu0 }
 0x353   :  { %v515_v3 = vpack.c.bf16 %v512_v1, %v509_v63 }
 0x355   :  { %v516_v4 = vmax.bf16 %v1558_v32, %v515_v3 }
 0x357   :  { %1203 = vmatmul.mubr.bf16.vlgmr.msra.gmra.mrb[4].mxu1 %v516_v4 }
 0x358   :  { %1242 = vmatprep.mubr.msk.bf16.mxu1 %vm1557_vm0, %v1556_v0  ;;  %1227 = vmatpush3.bf16.msra.mxu1 %v1321_v7 }
 0x359   :  { %1228 = vmatprep.subr.bf16.mxu1 %v1556_v0 }
 0x35c   :  { %1229 = vmatpush3.bf16.msra.mxu1 %v1322_v8 }
 0x35d   :  { %1230 = vmatprep.subr.bf16.mxu1 %v1556_v0 }
 0x360   :  { %1231 = vmatpush3.bf16.msra.mxu1 %v1323_v9 }
 0x361   :  { %1232 = vmatprep.subr.bf16.mxu1 %v1556_v0 }
 0x364   :  { %1233 = vmatpush3.bf16.msra.mxu1 %v1324_v10 }
 0x365   :  { %1234 = vmatprep.subr.bf16.mxu1 %v1556_v0 }
 0x368   :  { %1235 = vmatpush3.bf16.msra.mxu1 %v1325_v11 }
 0x369   :  { %1236 = vmatprep.subr.bf16.mxu1 %v1556_v0 }
 0x36c   :  { %1237 = vmatpush3.bf16.msra.mxu1 %v1326_v12 }
 0x36d   :  { %1238 = vmatprep.subr.bf16.mxu1 %v1556_v0 }
 0x370   :  { %1239 = vmatpush3.bf16.msra.mxu1 %v1327_v22 }
 0x371   :  { %1240 = vmatprep.subr.bf16.mxu1 %v1556_v0 }
 0x374   :  { %1241 = vmatpush3.bf16.msra.mxu1 %v1328_v23 }
 0x42a   :  { %v622_v14 = vpop.f32.mrb[4].mxu1 }
 0x42b   :  { %v1204_v15 = vpop.f32.mrb[5].mxu1  ;;  %v623_v17 = vadd.f32 %v1018_v13, %v622_v14 }
 0x42c   :  { %v625_v16 = vpop.f32.mrb[6].mxu1 }
 0x42d   :  { %v626_v18 = vadd.f32 %v1018_v13, %v625_v16  ;;  %v1205_v19 = vpop.f32.mrb[7].mxu1 }
 0x42f   :  { %v629_v20 = vpack.c.bf16 %v626_v18, %v623_v17 }
 0x431   :  { %v630_v21 = vmax.bf16 %v1558_v32, %v629_v20 }
 0x433   :  { %1223 = vmatmul.mubr.bf16.vlgmr.msra.gmra.mrb[8].mxu0 %v630_v21 }
 0x434   :  { %1262 = vmatprep.mubr.msk.bf16.mxu0 %vm1557_vm0, %v1556_v0  ;;  %1247 = vmatpush3.bf16.msra.mxu0 %v1329_v24 }
 0x435   :  { %1248 = vmatprep.subr.bf16.mxu0 %v1556_v0 }
 0x438   :  { %1249 = vmatpush3.bf16.msra.mxu0 %v1330_v25 }
 0x439   :  { %1250 = vmatprep.subr.bf16.mxu0 %v1556_v0 }
 0x43c   :  { %1251 = vmatpush3.bf16.msra.mxu0 %v1331_v26 }
 0x43d   :  { %1252 = vmatprep.subr.bf16.mxu0 %v1556_v0 }
 0x440   :  { %1253 = vmatpush3.bf16.msra.mxu0 %v1332_v27 }
 0x441   :  { %1254 = vmatprep.subr.bf16.mxu0 %v1556_v0 }
 0x444   :  { %1255 = vmatpush3.bf16.msra.mxu0 %v1333_v28 }
 0x445   :  { %1256 = vmatprep.subr.bf16.mxu0 %v1556_v0 }
 0x448   :  { %1257 = vmatpush3.bf16.msra.mxu0 %v1334_v29 }
 0x449   :  { %1258 = vmatprep.subr.bf16.mxu0 %v1556_v0 }
 0x44c   :  { %1259 = vmatpush3.bf16.msra.mxu0 %v1335_v40 }
 0x44d   :  { %1260 = vmatprep.subr.bf16.mxu0 %v1556_v0  ;;  %v1045_v0 = vld [vmem:[%s1919_s14] ss:$0 sm:$0xff] }
 0x450   :  { %1261 = vmatpush3.bf16.msra.mxu0 %v1336_v41 }
 0x506   :  { %v736_v31 = vpop.f32.mrb[8].mxu0 }
 0x507   :  { %v1224_v33 = vpop.f32.mrb[9].mxu0  ;;  %v737_v35 = vadd.f32 %v1027_v30, %v736_v31 }
 0x508   :  { %v739_v34 = vpop.f32.mrb[10].mxu0 }
 0x509   :  { %v740_v36 = vadd.f32 %v1027_v30, %v739_v34  ;;  %v1225_v37 = vpop.f32.mrb[11].mxu0 }
 0x50b   :  { %v743_v38 = vpack.c.bf16 %v740_v36, %v737_v35 }
 0x50d   :  { %v744_v39 = vmax.bf16 %v1558_v32, %v743_v38 }
 0x50f   :  { %1243 = vmatmul.mubr.bf16.vlgmr.msra.gmra.mrb[8].mxu1 %v744_v39 }
 0x5e2   :  { %v850_v43 = vpop.f32.mrb[8].mxu1 }
 0x5e3   :  { %v1244_v44 = vpop.f32.mrb[9].mxu1  ;;  %v851_v46 = vadd.f32 %v1036_v42, %v850_v43 }
 0x5e4   :  { %v853_v45 = vpop.f32.mrb[10].mxu1 }
 0x5e5   :  { %v854_v47 = vadd.f32 %v1036_v42, %v853_v45  ;;  %v1245_v48 = vpop.f32.mrb[11].mxu1 }
 0x5e7   :  { %v857_v49 = vpack.c.bf16 %v854_v47, %v851_v46 }
 0x5e9   :  { %v858_v50 = vmax.bf16 %v1558_v32, %v857_v49 }
 0x5eb   :  { %1263 = vmatmul.mubr.bf16.vlgmr.msra.gmra.mrb[12].mxu0 %v858_v50 }
 0x6be   :  { %v964_v51 = vpop.f32.mrb[12].mxu0 }
 0x6bf   :  { %v1264_v52 = vpop.f32.mrb[13].mxu0  ;;  %v965_v54 = vadd.f32 %v1045_v0, %v964_v51 }
 0x6c0   :  { %v967_v53 = vpop.f32.mrb[14].mxu0 }
 0x6c1   :  { %v968_v55 = vadd.f32 %v1045_v0, %v967_v53  ;;  %v1265_v56 = vpop.f32.mrb[15].mxu0 }
 0x6c3   :  { %v1061_v57 = vpack.c.bf16 %v968_v55, %v965_v54 }
 0x6c5   :  { %1062 = vst [vmem:[%s1920_s15] sm:$0xff] %v1061_v57  }
 0x6c6   :  { %985 = vsyncpa [#allocation3], 1 }
 0x6c7   :  { %986 = vsyncpa [#allocation5], 1 }
 0x6c8   :  { %987 = vsyncpa [#allocation8], 1 }
 0x6c9   :  { %988 = vsyncpa [#allocation11], 1 }
 0x6ca   :  { %989 = vsyncpa [#allocation14], 1 }

</bundles_post_ra>
